<compile_context>
chip_gen: v5e
topology: v5e:2x2
jax: 0.10.0
libtpu: 0.0.40
codegen_flags: <defaults>
</compile_context>

<pallas_src>
import jax
import jax.numpy as jnp
from jax.experimental import pallas as pl
from jax.experimental.pallas import tpu as pltpu


def _round_up(n, m):
    return ((n + m - 1) // m) * m


def _actor_kernel(x_ref, w1_ref, b1_ref, w2_ref, b2_ref, out_ref):
    # x_ref:  (TILE_B, D_pad)  bf16      w1_ref: (D_pad, H) bf16
    # b1_ref: (1, H)           f32       w2_ref: (H, A_pad) bf16
    # b2_ref: (1, A_pad)       f32       out_ref:(TILE_B, A_pad) f32
    h = jnp.dot(x_ref[...], w1_ref[...],
                preferred_element_type=jnp.float32)          # (TILE_B, H) f32
    h = jnp.maximum(h + b1_ref[...], 0.0)                    # bias + ReLU (f32)
    o = jnp.dot(h.astype(jnp.bfloat16), w2_ref[...],
                preferred_element_type=jnp.float32)          # (TILE_B, A_pad) f32
    out_ref[...] = jnp.tanh(o + b2_ref[...])                 # bias + Tanh (f32)


def actor_forward(x, w1, b1, w2, b2, *, tile_b=128):
    """x: (B, obs0, obs1) float32 -> (B, act_dim) float32."""
    B = x.shape[0]
    D = x.shape[1] * x.shape[2]
    H = w1.shape[1]
    A = w2.shape[1]

    D_pad = _round_up(D, 128)
    A_pad = _round_up(A, 128)
    B_pad = _round_up(max(B, tile_b), tile_b)

    # nn.Flatten + zero-pad to lane-dense shapes; matmul operands in bf16.
    x_flat = x.reshape(B, D)
    x_p = jnp.pad(x_flat.astype(jnp.bfloat16),
                  ((0, B_pad - B), (0, D_pad - D)))
    w1_p = jnp.pad(w1.astype(jnp.bfloat16), ((0, D_pad - D), (0, 0)))
    w2_p = jnp.pad(w2.astype(jnp.bfloat16), ((0, 0), (0, A_pad - A)))
    b1_2d = b1.reshape(1, H).astype(jnp.float32)
    b2_p = jnp.pad(b2.reshape(1, A).astype(jnp.float32),
                   ((0, 0), (0, A_pad - A)))

    grid = (B_pad // tile_b,)
    out = pl.pallas_call(
        _actor_kernel,
        out_shape=jax.ShapeDtypeStruct((B_pad, A_pad), jnp.float32),
        grid=grid,
        in_specs=[
            pl.BlockSpec((tile_b, D_pad), lambda i: (i, 0)),   # x (tiled over B)
            pl.BlockSpec((D_pad, H),      lambda i: (0, 0)),   # w1 (resident)
            pl.BlockSpec((1, H),          lambda i: (0, 0)),   # b1 (resident)
            pl.BlockSpec((H, A_pad),      lambda i: (0, 0)),   # w2 (resident)
            pl.BlockSpec((1, A_pad),      lambda i: (0, 0)),   # b2 (resident)
        ],
        out_specs=pl.BlockSpec((tile_b, A_pad), lambda i: (i, 0)),
        compiler_params=pltpu.CompilerParams(
            dimension_semantics=("parallel",),
        ),
    )(x_p, w1_p, b1_2d, w2_p, b2_p)

    # Slice padded rows / padded (zero-weight) action columns back off.
    return out[:B, :A]


def init_actor_params(key, obs_dim, act_dim, hidden=128):
    """Deterministic synthetic init (torch-style uniform(-1/sqrt(fan_in), +))."""
    d_in = obs_dim[0] * obs_dim[1]
    k1, k2, k3, k4 = jax.random.split(key, 4)
    lim1 = 1.0 / jnp.sqrt(d_in)
    lim2 = 1.0 / jnp.sqrt(hidden)
    w1 = jax.random.uniform(k1, (d_in, hidden), jnp.float32, -lim1, lim1)
    b1 = jax.random.uniform(k2, (hidden,), jnp.float32, -lim1, lim1)
    w2 = jax.random.uniform(k3, (hidden, act_dim), jnp.float32, -lim2, lim2)
    b2 = jax.random.uniform(k4, (act_dim,), jnp.float32, -lim2, lim2)
    return w1, b1, w2, b2


if __name__ == "__main__":
    key = jax.random.PRNGKey(0)
    k_x, k_p = jax.random.split(key)

    obs_dim = (4, 16)   # flattened feature dim = 64
    act_dim = 4
    batch = 8           # tiny RL batch; padded to one 128-row MXU tile inside

    x = jax.random.normal(k_x, (batch, obs_dim[0], obs_dim[1]), jnp.float32)
    w1, b1, w2, b2 = init_actor_params(k_p, obs_dim, act_dim)

    out = actor_forward(x, w1, b1, w2, b2)
    out = jax.block_until_ready(out)
    assert out.shape == (batch, act_dim)

    # Reference 1: exact same math (bf16 matmul inputs, f32 accumulation).
    xb = x.reshape(batch, -1).astype(jnp.bfloat16)
    h_ref = jnp.maximum(
        jnp.dot(xb, w1.astype(jnp.bfloat16),
                preferred_element_type=jnp.float32) + b1, 0.0)
    ref_bf16 = jnp.tanh(
        jnp.dot(h_ref.astype(jnp.bfloat16), w2.astype(jnp.bfloat16),
                preferred_element_type=jnp.float32) + b2)
    assert jnp.allclose(out, ref_bf16, atol=1e-5), "mismatch vs bf16-matched ref"

    # Reference 2: full-f32 PyTorch-equivalent math (loose tol for bf16 inputs).
    x_flat = x.reshape(batch, -1)
    ref_f32 = jnp.tanh(jnp.maximum(x_flat @ w1 + b1, 0.0) @ w2 + b2)
    assert jnp.allclose(out, ref_f32, atol=2e-2), "mismatch vs f32 reference"

    print("KERNEL_OK")
</pallas_src>

<mosaic_0001>
module attributes {stable_mosaic.version = 11 : i64} {
  func.func @_actor_kernel(%arg0: i32, %arg1: memref<128x128xbf16, #tpu.memory_space<vmem>>, %arg2: memref<128x128xbf16, #tpu.memory_space<vmem>>, %arg3: memref<1x128xf32, #tpu.memory_space<vmem>>, %arg4: memref<128x128xbf16, #tpu.memory_space<vmem>>, %arg5: memref<1x128xf32, #tpu.memory_space<vmem>>, %arg6: memref<128x128xf32, #tpu.memory_space<vmem>>) attributes {dimension_semantics = [#tpu.dimension_semantics<parallel>], iteration_bounds = array<i64: 1>, scalar_prefetch = 0 : i64, scratch_operands = 0 : i64, tpu.core_type = #tpu.core_type<tc>, window_params = [{transform_indices = @transform_0, window_bounds = array<i64: 128, 128>}, {pipeline_mode = #tpu.pipeline_mode<synchronous>, transform_indices = @transform_1, window_bounds = array<i64: 128, 128>}, {pipeline_mode = #tpu.pipeline_mode<synchronous>, transform_indices = @transform_2, window_bounds = array<i64: 1, 128>}, {pipeline_mode = #tpu.pipeline_mode<synchronous>, transform_indices = @transform_3, window_bounds = array<i64: 128, 128>}, {pipeline_mode = #tpu.pipeline_mode<synchronous>, transform_indices = @transform_4, window_bounds = array<i64: 1, 128>}, {transform_indices = @transform_5, window_bounds = array<i64: 128, 128>}]} {
    %c0 = arith.constant 0 : index
    %c0_0 = arith.constant 0 : index
    %0 = vector.load %arg1[%c0, %c0_0] : memref<128x128xbf16, #tpu.memory_space<vmem>>, vector<128x128xbf16>
    %c0_1 = arith.constant 0 : index
    %c0_2 = arith.constant 0 : index
    %1 = vector.load %arg2[%c0_1, %c0_2] : memref<128x128xbf16, #tpu.memory_space<vmem>>, vector<128x128xbf16>
    %cst = arith.constant dense<0.000000e+00> : vector<128x128xf32>
    %2 = tpu.matmul %0, %1, %cst {dimension_numbers = #tpu.dot_dimension_numbers<[1], [0], [0], [1], [0, 0, 1, 1], [], []>} : vector<128x128xbf16>, vector<128x128xbf16>, vector<128x128xf32> -> vector<128x128xf32>
    %c0_3 = arith.constant 0 : index
    %c0_4 = arith.constant 0 : index
    %3 = vector.load %arg3[%c0_3, %c0_4] : memref<1x128xf32, #tpu.memory_space<vmem>>, vector<1x128xf32>
    %4 = vector.broadcast %3 : vector<1x128xf32> to vector<128x128xf32>
    %5 = arith.addf %2, %4 : vector<128x128xf32>
    %cst_5 = arith.constant 0.000000e+00 : f32
    %6 = vector.broadcast %cst_5 : f32 to vector<128x128xf32>
    %7 = arith.maximumf %5, %6 : vector<128x128xf32>
    %8 = arith.truncf %7 : vector<128x128xf32> to vector<128x128xbf16>
    %c0_6 = arith.constant 0 : index
    %c0_7 = arith.constant 0 : index
    %9 = vector.load %arg4[%c0_6, %c0_7] : memref<128x128xbf16, #tpu.memory_space<vmem>>, vector<128x128xbf16>
    %cst_8 = arith.constant dense<0.000000e+00> : vector<128x128xf32>
    %10 = tpu.matmul %8, %9, %cst_8 {dimension_numbers = #tpu.dot_dimension_numbers<[1], [0], [0], [1], [0, 0, 1, 1], [], []>} : vector<128x128xbf16>, vector<128x128xbf16>, vector<128x128xf32> -> vector<128x128xf32>
    %c0_9 = arith.constant 0 : index
    %c0_10 = arith.constant 0 : index
    %11 = vector.load %arg5[%c0_9, %c0_10] : memref<1x128xf32, #tpu.memory_space<vmem>>, vector<1x128xf32>
    %12 = vector.broadcast %11 : vector<1x128xf32> to vector<128x128xf32>
    %13 = arith.addf %10, %12 : vector<128x128xf32>
    %14 = math.tanh %13 : vector<128x128xf32>
    %c0_11 = arith.constant 0 : index
    %c0_12 = arith.constant 0 : index
    %15 = vector.load %arg6[%c0_11, %c0_12] : memref<128x128xf32, #tpu.memory_space<vmem>>, vector<128x128xf32>
    tpu.vector_store %arg6[%c0_11, %c0_12], %14 {strides = array<i32>} : memref<128x128xf32, #tpu.memory_space<vmem>>, vector<128x128xf32>,
    return
  }
  func.func @transform_0(%arg0: i32) -> (i32, i32) {
    %c0_i32 = arith.constant 0 : i32
    %c0_i32_0 = arith.constant 0 : i32
    return %arg0, %c0_i32 : i32, i32
  }
  func.func @transform_1(%arg0: i32) -> (i32, i32) {
    %c0_i32 = arith.constant 0 : i32
    %c0_i32_0 = arith.constant 0 : i32
    %c0_i32_1 = arith.constant 0 : i32
    return %c0_i32, %c0_i32_0 : i32, i32
  }
  func.func @transform_2(%arg0: i32) -> (i32, i32) {
    %c0_i32 = arith.constant 0 : i32
    %c0_i32_0 = arith.constant 0 : i32
    %c0_i32_1 = arith.constant 0 : i32
    return %c0_i32, %c0_i32_0 : i32, i32
  }
  func.func @transform_3(%arg0: i32) -> (i32, i32) {
    %c0_i32 = arith.constant 0 : i32
    %c0_i32_0 = arith.constant 0 : i32
    %c0_i32_1 = arith.constant 0 : i32
    return %c0_i32, %c0_i32_0 : i32, i32
  }
  func.func @transform_4(%arg0: i32) -> (i32, i32) {
    %c0_i32 = arith.constant 0 : i32
    %c0_i32_0 = arith.constant 0 : i32
    %c0_i32_1 = arith.constant 0 : i32
    return %c0_i32, %c0_i32_0 : i32, i32
  }
  func.func @transform_5(%arg0: i32) -> (i32, i32) {
    %c0_i32 = arith.constant 0 : i32
    %c0_i32_0 = arith.constant 0 : i32
    return %arg0, %c0_i32 : i32, i32
  }
}

</mosaic_0001>

<bundles_post_ra>
// kernel: tpu_custom_call.1
= control target key start
LH: loop header
LB: loop body
LE: loop exit
PB: predicated region body
PF: predicated region fallthrough
CT: control target
= control target key end

     0   :  { %10 = vsyncpa [#allocation3], 0  ;;  %s796_s0 = inlined_call_operand.hbm [shape: bf16[128,128], index: 0, kind: input, shape index: {}]   ;;  %s797_s1 = inlined_call_operand.hbm [shape: bf16[128,128], index: 1, kind: input, shape index: {}]   ;;  %s798_s2 = inlined_call_operand.vmem [shape: f32[1,128], index: 2, kind: input, shape index: {}]   ;;  %s799_s3 = inlined_call_operand.hbm [shape: bf16[128,128], index: 3, kind: input, shape index: {}]   ;;  %s800_s4 = inlined_call_operand.vmem [shape: f32[1,128], index: 4, kind: input, shape index: {}]   ;;  %s801_s5 = inlined_call_operand.hbm [shape: f32[128,128], index: 5, kind: output, shape index: {}]  }
   0x1   :  { %11 = vsyncpa [#allocation6], 0 }
   0x2   :  { %12 = vsyncpa [#allocation4], 0  ;;  %s30_s20 = sshll.u32 %s797_s1, 4  ;;  %s722_s21 = smov [#allocation5]   ;;  %s31_s20 = int_to_ptr.hbm [resolvable:$true] %s30_s20 }
   0x3   :  { %s32_s22 = sshll.u32 %s722_s21, 4  ;;  %s17_s25 = sshll.u32 %s796_s0, 4  ;;  %s33_s22 = int_to_ptr.vmem [resolvable:$true] %s32_s22  ;;  %s18_s25 = int_to_ptr.hbm [resolvable:$true] %s17_s25 }
   0x4   :  { %s723_s26 = smov 64   ;;  %s724_s27 = smov 4  }
   0x5   :  { %38 = dma.hbm_to_vmem [thread:$0]  %s31_s20, 1024, %s33_s22, [#allocation6], %s723_s26, %s723_s26, %s724_s27  }
   0x6   :  { %s725_s28 = smov [#allocation2]   ;;  %s45_s7 = sshll.u32 %s799_s3, 4  ;;  %s46_s7 = int_to_ptr.hbm [resolvable:$true] %s45_s7 }
   0x7   :  { %s19_s29 = sshll.u32 %s725_s28, 4  ;;  %s726_s1 = smov [#allocation7]   ;;  %s20_s29 = int_to_ptr.vmem [resolvable:$true] %s19_s29 }
   0x8   :  { %25 = dma.hbm_to_vmem [thread:$0]  %s18_s25, 1024, %s20_s29, [#allocation3], %s723_s26, %s723_s26, %s724_s27  }
   0x9   :  { %s47_s8 = sshll.u32 %s726_s1, 4  ;;  %s48_s8 = int_to_ptr.vmem [resolvable:$true] %s47_s8 }
   0xa   :  { %53 = dma.hbm_to_vmem [thread:$0]  %s46_s7, 1024, %s48_s8, [#allocation6], %s723_s26, %s723_s26, %s724_s27  }
   0xb   :  { %716 = dma.done.wait [#allocation3], 1024  }
   0xc   :  { %717 = vsyncadd [#allocation3], 4294966272 }
   0xd   :  { %718 = dma.done.wait [#allocation6], 2048  }
   0xe   :  { %719 = vsyncadd [#allocation6], 4294965248  ;;  %v553_v0 = vld [vmem:[#allocation5 + $0x38] sm:$0xff]  ;;  %v552_v1 = vld [vmem:[#allocation5 + $0x30] sm:$0xff]  ;;  %s428_s13 = sshll.u32 %s801_s5, 4  ;;  %s728_s14 = smov 128   ;;  %s429_s13 = int_to_ptr.hbm [resolvable:$true] %s428_s13 }
   0xf   :  { %200 = vmatpush.bf16.msra.mxu0 %v553_v0  ;;  %562 = vmatpush.bf16.msra.mxu2 %v553_v0  ;;  %v551_v2 = vld [vmem:[#allocation5 + $0x28] sm:$0xff]  ;;  %v550_v3 = vld [vmem:[#allocation5 + $0x20] sm:$0xff]  ;;  %v549_v4 = vld [vmem:[#allocation5 + $0x18] sm:$0xff]  ;;  %s729_s15 = smov 8  }
  0x10   :  { %v548_v5 = vld [vmem:[#allocation5 + $0x10] sm:$0xff]  ;;  %v547_v6 = vld [vmem:[#allocation5 + $0x8] sm:$0xff]  ;;  %v546_v7 = vld [vmem:[#allocation5] sm:$0xff] }
  0x11   :  { %v538_v8 = vld [vmem:[#allocation2] sm:$0xff]  ;;  %v539_v10 = vld [vmem:[#allocation2 + $0x8] sm:$0xff]  ;;  %v561_v12 = vld [vmem:[#allocation7 + $0x38] sm:$0xff] }
  0x12   :  { %v542_v9 = vld [vmem:[#allocation2 + $0x20] sm:$0xff]  ;;  %v543_v11 = vld [vmem:[#allocation2 + $0x28] sm:$0xff]  ;;  %341 = vmatpush.bf16.msra.mxu1 %v561_v12  ;;  %v560_v13 = vld [vmem:[#allocation7 + $0x30] sm:$0xff]  ;;  %570 = vmatpush.bf16.msra.mxu3 %v561_v12 }
  0x13   :  { %201 = vmatpush.bf16.msra.mxu0 %v552_v1  ;;  %563 = vmatpush.bf16.msra.mxu2 %v552_v1  ;;  %v559_v14 = vld [vmem:[#allocation7 + $0x28] sm:$0xff]  ;;  %v558_v15 = vld [vmem:[#allocation7 + $0x20] sm:$0xff]  ;;  %v540_v16 = vld [vmem:[#allocation2 + $0x10] sm:$0xff] }
  0x14   :  { %v544_v17 = vld [vmem:[#allocation2 + $0x30] sm:$0xff]  ;;  %v541_v18 = vld [vmem:[#allocation2 + $0x18] sm:$0xff]  ;;  %v555_v22 = vld [vmem:[#allocation7 + $0x8] sm:$0xff] }
  0x15   :  { %v545_v19 = vld [vmem:[#allocation2 + $0x38] sm:$0xff]  ;;  %v556_v21 = vld [vmem:[#allocation7 + $0x10] sm:$0xff]  ;;  %v554_v23 = vld [vmem:[#allocation7] sm:$0xff] }
  0x16   :  { %342 = vmatpush.bf16.msra.mxu1 %v560_v13  ;;  %571 = vmatpush.bf16.msra.mxu3 %v560_v13  ;;  %v557_v20 = vld [vmem:[#allocation7 + $0x18] sm:$0xff]  ;;  %v586_v25 = vld [vmem:[%s798_s2] ss:$0 sm:$0xff] }
  0x17   :  { %202 = vmatpush.bf16.msra.mxu0 %v551_v2  ;;  %564 = vmatpush.bf16.msra.mxu2 %v551_v2 }
  0x1a   :  { %343 = vmatpush.bf16.msra.mxu1 %v559_v14  ;;  %572 = vmatpush.bf16.msra.mxu3 %v559_v14 }
  0x1b   :  { %203 = vmatpush.bf16.msra.mxu0 %v550_v3  ;;  %565 = vmatpush.bf16.msra.mxu2 %v550_v3 }
  0x1e   :  { %344 = vmatpush.bf16.msra.mxu1 %v558_v15  ;;  %573 = vmatpush.bf16.msra.mxu3 %v558_v15 }
  0x1f   :  { %204 = vmatpush.bf16.msra.mxu0 %v549_v4  ;;  %566 = vmatpush.bf16.msra.mxu2 %v549_v4 }
  0x22   :  { %345 = vmatpush.bf16.msra.mxu1 %v557_v20  ;;  %574 = vmatpush.bf16.msra.mxu3 %v557_v20 }
  0x23   :  { %205 = vmatpush.bf16.msra.mxu0 %v548_v5  ;;  %567 = vmatpush.bf16.msra.mxu2 %v548_v5 }
  0x26   :  { %346 = vmatpush.bf16.msra.mxu1 %v556_v21  ;;  %575 = vmatpush.bf16.msra.mxu3 %v556_v21 }
  0x27   :  { %206 = vmatpush.bf16.msra.mxu0 %v547_v6  ;;  %568 = vmatpush.bf16.msra.mxu2 %v547_v6 }
  0x2a   :  { %347 = vmatpush.bf16.msra.mxu1 %v555_v22  ;;  %576 = vmatpush.bf16.msra.mxu3 %v555_v22 }
  0x2b   :  { %207 = vmatpush.bf16.msra.mxu0 %v546_v7  ;;  %569 = vmatpush.bf16.msra.mxu2 %v546_v7 }
  0x2e   :  { %208 = vmatmul.bf16.vlgmr.msra.gmra.mxu0 %v538_v8  ;;  %228 = vmatmul.bf16.vlgmr.msra.gmra.mxu2 %v542_v9 }
  0x2f   :  { %348 = vmatpush.bf16.msra.mxu1 %v554_v23  ;;  %577 = vmatpush.bf16.msra.mxu3 %v554_v23 }
  0x3e   :  { %213 = vmatmul.bf16.gmra.mxu0 %v539_v10  ;;  %233 = vmatmul.bf16.gmra.mxu2 %v543_v11 }
  0x4e   :  { %218 = vmatmul.bf16.gmra.mxu0 %v540_v16  ;;  %238 = vmatmul.bf16.gmra.mxu2 %v544_v17  ;;  %v775_v17 = vld [vmem:[%s800_s4] ss:$0 sm:$0xff]  ;;  %s727_s4 = smov [#allocation8]  }
  0x4f   :  { %s426_s10 = sshll.u32 %s727_s4, 4  ;;  %s427_s10 = int_to_ptr.vmem [resolvable:$true] %s426_s10 }
  0x5e   :  { %223 = vmatmul.bf16.gmra.mxu0 %v541_v18  ;;  %243 = vmatmul.bf16.gmra.mxu2 %v545_v19 }
  0xab   :  { %v209_v24 = vpop.f32.mrf.mxu0 }
  0xac   :  { %v210_v26 = vadd.f32 %v586_v25, %v209_v24 }
  0xae   :  { %v249_v29 = vmax.f32 %v210_v26, 0.0 }
  0xb1   :  { %v229_v27 = vpop.f32.mrf.mxu2 }
  0xb2   :  { %v230_v32 = vadd.f32 %v586_v25, %v229_v27 }
  0xb3   :  { %v211_v28 = vpop.f32.mrf.mxu0 }
  0xb4   :  { %v212_v30 = vadd.f32 %v586_v25, %v211_v28  ;;  %v257_v37 = vmax.f32 %v230_v32, 0.0 }
  0xb6   :  { %v250_v31 = vmax.f32 %v212_v30, 0.0 }
  0xb8   :  { %v265_v33 = vpack.c.bf16 %v250_v31, %v249_v29 }
  0xb9   :  { %v231_v34 = vpop.f32.mrf.mxu2 }
  0xba   :  { %v232_v35 = vadd.f32 %v586_v25, %v231_v34  ;;  %349 = vmatmul.bf16.vlgmr.msra.gmra.mxu1 %v265_v33 }
  0xbb   :  { %v214_v36 = vpop.f32.mrf.mxu0 }
  0xbc   :  { %v258_v38 = vmax.f32 %v232_v35, 0.0  ;;  %v215_v40 = vadd.f32 %v586_v25, %v214_v36 }
  0xbe   :  { %v269_v39 = vpack.c.bf16 %v258_v38, %v257_v37  ;;  %v251_v43 = vmax.f32 %v215_v40, 0.0 }
  0xc0   :  { %369 = vmatmul.bf16.vlgmr.msra.gmra.mxu3 %v269_v39 }
  0xc1   :  { %v234_v41 = vpop.f32.mrf.mxu2 }
  0xc2   :  { %v235_v46 = vadd.f32 %v586_v25, %v234_v41 }
  0xc3   :  { %v216_v42 = vpop.f32.mrf.mxu0 }
  0xc4   :  { %v217_v44 = vadd.f32 %v586_v25, %v216_v42  ;;  %v259_v51 = vmax.f32 %v235_v46, 0.0 }
  0xc6   :  { %v252_v45 = vmax.f32 %v217_v44, 0.0 }
  0xc8   :  { %v266_v47 = vpack.c.bf16 %v252_v45, %v251_v43 }
  0xc9   :  { %v236_v48 = vpop.f32.mrf.mxu2 }
  0xca   :  { %v237_v49 = vadd.f32 %v586_v25, %v236_v48  ;;  %354 = vmatmul.bf16.gmra.mxu1 %v266_v47 }
  0xcb   :  { %v219_v50 = vpop.f32.mrf.mxu0 }
  0xcc   :  { %v260_v52 = vmax.f32 %v237_v49, 0.0  ;;  %v220_v54 = vadd.f32 %v586_v25, %v219_v50 }
  0xce   :  { %v270_v53 = vpack.c.bf16 %v260_v52, %v259_v51  ;;  %v253_v57 = vmax.f32 %v220_v54, 0.0 }
  0xd0   :  { %374 = vmatmul.bf16.gmra.mxu3 %v270_v53 }
  0xd1   :  { %v239_v55 = vpop.f32.mrf.mxu2 }
  0xd2   :  { %v240_v60 = vadd.f32 %v586_v25, %v239_v55 }
  0xd3   :  { %v221_v56 = vpop.f32.mrf.mxu0 }
  0xd4   :  { %v222_v58 = vadd.f32 %v586_v25, %v221_v56  ;;  %v261_v1 = vmax.f32 %v240_v60, 0.0 }
  0xd6   :  { %v254_v59 = vmax.f32 %v222_v58, 0.0 }
  0xd8   :  { %v267_v61 = vpack.c.bf16 %v254_v59, %v253_v57 }
  0xd9   :  { %v241_v62 = vpop.f32.mrf.mxu2 }
  0xda   :  { %v242_v63 = vadd.f32 %v586_v25, %v241_v62  ;;  %359 = vmatmul.bf16.gmra.mxu1 %v267_v61 }
  0xdb   :  { %v224_v0 = vpop.f32.mrf.mxu0 }
  0xdc   :  { %v262_v2 = vmax.f32 %v242_v63, 0.0  ;;  %v225_v4 = vadd.f32 %v586_v25, %v224_v0 }
  0xde   :  { %v271_v3 = vpack.c.bf16 %v262_v2, %v261_v1  ;;  %v255_v7 = vmax.f32 %v225_v4, 0.0 }
  0xe0   :  { %379 = vmatmul.bf16.gmra.mxu3 %v271_v3 }
  0xe1   :  { %v244_v5 = vpop.f32.mrf.mxu2 }
  0xe2   :  { %v245_v10 = vadd.f32 %v586_v25, %v244_v5 }
  0xe3   :  { %v226_v6 = vpop.f32.mrf.mxu0 }
  0xe4   :  { %v227_v8 = vadd.f32 %v586_v25, %v226_v6  ;;  %v263_v14 = vmax.f32 %v245_v10, 0.0 }
  0xe6   :  { %v256_v9 = vmax.f32 %v227_v8, 0.0 }
  0xe8   :  { %v268_v11 = vpack.c.bf16 %v256_v9, %v255_v7 }
  0xe9   :  { %v246_v12 = vpop.f32.mrf.mxu2 }
  0xea   :  { %v247_v13 = vadd.f32 %v586_v25, %v246_v12  ;;  %364 = vmatmul.bf16.gmra.mxu1 %v268_v11 }
  0xec   :  { %v264_v15 = vmax.f32 %v247_v13, 0.0 }
  0xee   :  { %v272_v16 = vpack.c.bf16 %v264_v15, %v263_v14 }
  0xf0   :  { %384 = vmatmul.bf16.gmra.mxu3 %v272_v16 }
 0x137   :  { %v350_v18 = vpop.f32.mrf.mxu1 }
 0x138   :  { %v351_v19 = vadd.f32 %v775_v17, %v350_v18 }
 0x13a   :  { %588 = vtanh.f32 %v351_v19 }
 0x13f   :  { %v352_v20 = vpop.f32.mrf.mxu1 }
 0x140   :  { %v589_v21 = vpop.eup %588  ;;  %v353_v22 = vadd.f32 %v775_v17, %v352_v20 }
 0x141   :  { %406 = vst [vmem:[#allocation8] sm:$0xff] %v589_v21 }
 0x142   :  { %590 = vtanh.f32 %v353_v22 }
 0x143   :  { %v370_v23 = vpop.f32.mrf.mxu3 }
 0x144   :  { %v371_v24 = vadd.f32 %v775_v17, %v370_v23 }
 0x146   :  { %592 = vtanh.f32 %v371_v24 }
 0x147   :  { %v355_v25 = vpop.f32.mrf.mxu1 }
 0x148   :  { %v591_v26 = vpop.eup %590  ;;  %v356_v27 = vadd.f32 %v775_v17, %v355_v25 }
 0x149   :  { %407 = vst [vmem:[#allocation8 + $0x8] sm:$0xff] %v591_v26 }
 0x14a   :  { %594 = vtanh.f32 %v356_v27 }
 0x14b   :  { %v372_v28 = vpop.f32.mrf.mxu3 }
 0x14c   :  { %v593_v29 = vpop.eup %592  ;;  %v373_v30 = vadd.f32 %v775_v17, %v372_v28 }
 0x14d   :  { %414 = vst [vmem:[#allocation8 + $0x40] sm:$0xff] %v593_v29 }
 0x14e   :  { %596 = vtanh.f32 %v373_v30 }
 0x14f   :  { %v357_v31 = vpop.f32.mrf.mxu1 }
 0x150   :  { %v595_v32 = vpop.eup %594  ;;  %v358_v33 = vadd.f32 %v775_v17, %v357_v31 }
 0x151   :  { %408 = vst [vmem:[#allocation8 + $0x10] sm:$0xff] %v595_v32 }
 0x152   :  { %598 = vtanh.f32 %v358_v33 }
 0x153   :  { %v375_v34 = vpop.f32.mrf.mxu3 }
 0x154   :  { %v597_v35 = vpop.eup %596  ;;  %v376_v36 = vadd.f32 %v775_v17, %v375_v34 }
 0x155   :  { %415 = vst [vmem:[#allocation8 + $0x48] sm:$0xff] %v597_v35 }
 0x156   :  { %600 = vtanh.f32 %v376_v36 }
 0x157   :  { %v360_v37 = vpop.f32.mrf.mxu1 }
 0x158   :  { %v599_v38 = vpop.eup %598  ;;  %v361_v39 = vadd.f32 %v775_v17, %v360_v37 }
 0x159   :  { %409 = vst [vmem:[#allocation8 + $0x18] sm:$0xff] %v599_v38 }
 0x15a   :  { %602 = vtanh.f32 %v361_v39 }
 0x15b   :  { %v377_v40 = vpop.f32.mrf.mxu3 }
 0x15c   :  { %v601_v41 = vpop.eup %600  ;;  %v378_v42 = vadd.f32 %v775_v17, %v377_v40 }
 0x15d   :  { %416 = vst [vmem:[#allocation8 + $0x50] sm:$0xff] %v601_v41 }
 0x15e   :  { %604 = vtanh.f32 %v378_v42 }
 0x15f   :  { %v362_v43 = vpop.f32.mrf.mxu1 }
 0x160   :  { %v603_v44 = vpop.eup %602  ;;  %v363_v45 = vadd.f32 %v775_v17, %v362_v43 }
 0x161   :  { %410 = vst [vmem:[#allocation8 + $0x20] sm:$0xff] %v603_v44 }
 0x162   :  { %606 = vtanh.f32 %v363_v45 }
 0x163   :  { %v380_v46 = vpop.f32.mrf.mxu3 }
 0x164   :  { %v605_v47 = vpop.eup %604  ;;  %v381_v48 = vadd.f32 %v775_v17, %v380_v46 }
 0x165   :  { %417 = vst [vmem:[#allocation8 + $0x58] sm:$0xff] %v605_v47 }
 0x166   :  { %608 = vtanh.f32 %v381_v48 }
 0x167   :  { %v365_v49 = vpop.f32.mrf.mxu1 }
 0x168   :  { %v607_v50 = vpop.eup %606  ;;  %v366_v51 = vadd.f32 %v775_v17, %v365_v49 }
 0x169   :  { %411 = vst [vmem:[#allocation8 + $0x28] sm:$0xff] %v607_v50 }
 0x16a   :  { %610 = vtanh.f32 %v366_v51 }
 0x16b   :  { %v382_v52 = vpop.f32.mrf.mxu3 }
 0x16c   :  { %v609_v53 = vpop.eup %608  ;;  %v383_v54 = vadd.f32 %v775_v17, %v382_v52 }
 0x16d   :  { %418 = vst [vmem:[#allocation8 + $0x60] sm:$0xff] %v609_v53 }
 0x16e   :  { %612 = vtanh.f32 %v383_v54 }
 0x16f   :  { %v367_v55 = vpop.f32.mrf.mxu1 }
 0x170   :  { %v611_v56 = vpop.eup %610  ;;  %v368_v57 = vadd.f32 %v775_v17, %v367_v55 }
 0x171   :  { %412 = vst [vmem:[#allocation8 + $0x30] sm:$0xff] %v611_v56 }
 0x172   :  { %614 = vtanh.f32 %v368_v57 }
 0x173   :  { %v385_v58 = vpop.f32.mrf.mxu3 }
 0x174   :  { %v613_v59 = vpop.eup %612  ;;  %v386_v60 = vadd.f32 %v775_v17, %v385_v58 }
 0x175   :  { %419 = vst [vmem:[#allocation8 + $0x68] sm:$0xff] %v613_v59 }
 0x176   :  { %616 = vtanh.f32 %v386_v60 }
 0x178   :  { %v615_v61 = vpop.eup %614 }
 0x179   :  { %413 = vst [vmem:[#allocation8 + $0x38] sm:$0xff] %v615_v61 }
 0x17b   :  { %v387_v62 = vpop.f32.mrf.mxu3 }
 0x17c   :  { %v617_v63 = vpop.eup %616  ;;  %v388_v0 = vadd.f32 %v775_v17, %v387_v62 }
 0x17d   :  { %420 = vst [vmem:[#allocation8 + $0x70] sm:$0xff] %v617_v63 }
 0x17e   :  { %618 = vtanh.f32 %v388_v0 }
 0x184   :  { %v619_v1 = vpop.eup %618 }
 0x185   :  { %421 = vst [vmem:[#allocation8 + $0x78] sm:$0xff] %v619_v1 }
 0x186   :  { %434 = dma.vmem_to_hbm [thread:$0]  %s427_s10, 2048, %s429_s13, [#allocation4], %s728_s14, %s728_s14, %s729_s15  }
 0x187   :  { %720 = dma.done.wait [#allocation4], 2048  }
 0x188   :  { %721 = vsyncadd [#allocation4], 4294965248 }
 0x189   :  { %439 = vsyncpa [#allocation3], 1 }
 0x18a   :  { %440 = vsyncpa [#allocation6], 1 }
 0x18b   :  { %441 = vsyncpa [#allocation4], 1 }

</bundles_post_ra>
